<compile_context>
chip_gen: v7x
topology: tpu7x:2x2x1
jax: 0.10.0
libtpu: 0.0.40
codegen_flags: <defaults>
</compile_context>

<pallas_src>
import functools

import jax
import jax.numpy as jnp
from jax.experimental import pallas as pl
from jax.experimental.pallas import tpu as pltpu

LANE = 128     # TPU vreg lane width
SUBLANE = 8    # f32 sublane count


def _round_up(x, m):
    return (x + m - 1) // m * m


def _choose_tb(batch, max_tb=1024):
    """Batch-tile rows.

    - batch < 256: one tile covering the whole batch (block == full dim, so any
      batch size is legal).
    - batch >= 256: at least 2 tiles (keeps both v7x TensorCores busy via the
      "parallel" grid axis and gives the pipeline DMA/compute overlap), each tile
      a multiple of 8 rows and at most `max_tb` rows (512-1024-row tiles reach
      ~85% of HBM roofline on v5e/v6e; per-step overhead amortized).
    """
    if batch < 256:
        return batch
    n_tiles = max(2, pl.cdiv(batch, max_tb))
    return min(_round_up(pl.cdiv(batch, n_tiles), SUBLANE), max_tb)


def mlp_kernel(x_ref, w1_ref, b1_ref, w2_ref, b2_ref, w3_ref, b3_ref, o_ref,
               *, compute_dtype):
    # All casts happen in VMEM (VPU, effectively free) so the wrapper launches no
    # extra XLA ops and x is read from HBM exactly once at its native width.
    x = x_ref[...].astype(compute_dtype)

    # Layer 1: Linear + ReLU  (bf16 MXU operands, f32 accumulate, f32 epilogue)
    h = jnp.dot(x, w1_ref[...].astype(compute_dtype),
                preferred_element_type=jnp.float32)
    h = jnp.maximum(h + b1_ref[...].astype(jnp.float32), 0.0)

    # Layer 2: Linear + ReLU
    h = jnp.dot(h.astype(compute_dtype), w2_ref[...].astype(compute_dtype),
                preferred_element_type=jnp.float32)
    h = jnp.maximum(h + b2_ref[...].astype(jnp.float32), 0.0)

    # Layer 3: Linear (no activation). Output block is the unpadded (tb, D_out)
    # slab: HBM writes are exactly the real output bytes.
    out = jnp.dot(h.astype(compute_dtype), w3_ref[...].astype(compute_dtype),
                  preferred_element_type=jnp.float32)
    out = out + b3_ref[...].astype(jnp.float32)
    o_ref[...] = out.astype(o_ref.dtype)


def _vmem_limit_bytes(tb, D_in, H1, H2, D_out, x_itemsize, w_itemsize, c_itemsize):
    est = (2 * tb * D_in * x_itemsize                              # x tiles (dbl buf)
           + 2 * tb * D_out * x_itemsize                           # out tiles (dbl buf)
           + 2 * (D_in * H1 + H1 * H2 + H2 * D_out) * w_itemsize   # resident weights
           + 2 * (H1 + H2 + D_out) * 4                             # resident biases
           + 2 * tb * (H1 + H2 + D_out) * 4                        # f32 intermediates
           + tb * (D_in + H1 + H2) * c_itemsize)                   # bf16 operands
    # Floor at 16 MiB (v5e default), cap at 48 MiB (safe under v7x's 64 MiB VMEM).
    return int(min(max(2 * est, 16 << 20), 48 << 20))


def mlp_backbone(x, w1, b1, w2, b2, w3, b3, *, tb=None,
                 compute_dtype=jnp.bfloat16):
    """Fused 3-layer MLP forward: relu(relu(x@w1+b1)@w2+b2)@w3+b3.

    x: (B, D_in). Weights are (in, out) (transposed vs. torch), biases (1, out).
    Weights/biases may be any float dtype; they are cast to `compute_dtype`
    inside the kernel (bf16 matmuls, f32 accumulate/epilogue). Note: bf16
    matmul operands mean numerics differ slightly from a pure-f32 PyTorch
    MLPBackbone; pass compute_dtype=jnp.float32 for f32-exact math.
    """
    B, D_in = x.shape
    H1 = w1.shape[1]
    H2 = w2.shape[1]
    D_out = w3.shape[1]
    out_dtype = x.dtype

    if tb is None:
        tb = _choose_tb(B)
    tb = max(1, min(int(tb), B))
    if tb != B:
        tb = _round_up(tb, SUBLANE)      # block sublane dim must be 8-aligned
    n_tiles = pl.cdiv(B, tb)             # ragged last tile handled by Pallas clipping

    def _batch_map(i):
        return (i, 0)

    def _const_map(i):
        return (0, 0)                    # weights/biases resident across the grid

    flops = 2 * B * (D_in * H1 + H1 * H2 + H2 * D_out)
    bytes_accessed = int(
        x.size * x.dtype.itemsize
        + B * D_out * jnp.dtype(out_dtype).itemsize
        + sum(int(a.size) * a.dtype.itemsize for a in (w1, b1, w2, b2, w3, b3)))

    vmem_limit = _vmem_limit_bytes(
        tb, D_in, H1, H2, D_out,
        jnp.dtype(x.dtype).itemsize,
        jnp.dtype(w1.dtype).itemsize,
        jnp.dtype(compute_dtype).itemsize)

    kernel = functools.partial(mlp_kernel, compute_dtype=compute_dtype)

    out = pl.pallas_call(
        kernel,
        out_shape=jax.ShapeDtypeStruct((B, D_out), out_dtype),
        grid_spec=pltpu.PrefetchScalarGridSpec(
            num_scalar_prefetch=0,
            grid=(n_tiles,),
            in_specs=[
                pl.BlockSpec((tb, D_in), _batch_map),      # x tile (native dtype)
                pl.BlockSpec((D_in, H1), _const_map),
                pl.BlockSpec((1, H1), _const_map),
                pl.BlockSpec((H1, H2), _const_map),
                pl.BlockSpec((1, H2), _const_map),
                pl.BlockSpec((H2, D_out), _const_map),
                pl.BlockSpec((1, D_out), _const_map),
            ],
            out_specs=pl.BlockSpec((tb, D_out), _batch_map),
        ),
        compiler_params=pltpu.CompilerParams(
            dimension_semantics=("parallel",),   # batch tiles -> v7x megacore
            vmem_limit_bytes=vmem_limit,
        ),
        cost_estimate=pl.CostEstimate(
            flops=flops, transcendentals=0, bytes_accessed=bytes_accessed),
    )(x, w1, b1, w2, b2, w3, b3)

    return out


def init_linear(key, in_dim, out_dim, dtype=jnp.float32):
    # Deterministic PyTorch-style uniform(-1/sqrt(in), 1/sqrt(in)) init.
    kw, kb = jax.random.split(key)
    bound = 1.0 / (in_dim ** 0.5)
    w = jax.random.uniform(kw, (in_dim, out_dim), dtype, -bound, bound)
    b = jax.random.uniform(kb, (1, out_dim), dtype, -bound, bound)
    return w, b


def reference_mlp(x, w1, b1, w2, b2, w3, b3, compute_dtype=jnp.bfloat16):
    # Same numerics as the kernel: bf16 matmul operands, f32 accumulate/epilogue.
    cd = compute_dtype
    h = jnp.dot(x.astype(cd), w1.astype(cd), preferred_element_type=jnp.float32)
    h = jnp.maximum(h + b1.astype(jnp.float32), 0.0)
    h = jnp.dot(h.astype(cd), w2.astype(cd), preferred_element_type=jnp.float32)
    h = jnp.maximum(h + b2.astype(jnp.float32), 0.0)
    out = jnp.dot(h.astype(cd), w3.astype(cd), preferred_element_type=jnp.float32)
    return (out + b3.astype(jnp.float32)).astype(x.dtype)


def reference_f32(x, w1, b1, w2, b2, w3, b3):
    return jnp.maximum(jnp.maximum(x @ w1 + b1, 0.0) @ w2 + b2, 0.0) @ w3 + b3


if __name__ == "__main__":
    # Shapes consistent with the module: input_dim=32, hidden=[128, 64], output_dim=16.
    # Batch 256 -> tb=128 -> grid=(2,): multi-tile pipeline (both v7x TCs busy).
    B, D_in, H1, H2, D_out = 256, 32, 128, 64, 16

    key = jax.random.PRNGKey(0)
    kx, k1, k2, k3 = jax.random.split(key, 4)

    x = jax.random.normal(kx, (B, D_in), jnp.float32)
    w1, b1 = init_linear(k1, D_in, H1)
    w2, b2 = init_linear(k2, H1, H2)
    w3, b3 = init_linear(k3, H2, D_out)

    out = mlp_backbone(x, w1, b1, w2, b2, w3, b3)
    out = jax.block_until_ready(out)

    ref = reference_mlp(x, w1, b1, w2, b2, w3, b3)
    ref32 = reference_f32(x, w1, b1, w2, b2, w3, b3)

    assert out.shape == (B, D_out)
    assert out.dtype == x.dtype
    assert jnp.allclose(out, ref, atol=2e-3, rtol=2e-3)       # kernel vs bf16 reference
    assert jnp.allclose(out, ref32, atol=5e-2, rtol=5e-2)     # sanity vs full-f32 math

    # Ragged batch (B=300 -> tb=152, grid=(2,), last tile clipped by Pallas):
    # exercises the no-pad partial-block path.
    B2 = 300
    x2 = jax.random.normal(jax.random.PRNGKey(1), (B2, D_in), jnp.float32)
    out2 = jax.block_until_ready(mlp_backbone(x2, w1, b1, w2, b2, w3, b3))
    ref2 = reference_mlp(x2, w1, b1, w2, b2, w3, b3)
    assert out2.shape == (B2, D_out)
    assert jnp.allclose(out2, ref2, atol=2e-3, rtol=2e-3)

    print("KERNEL_OK")
</pallas_src>

<mosaic_0001>
module attributes {stable_mosaic.version = 11 : i64} {
  func.func @mlp_kernel(%arg0: i32, %arg1: memref<128x32xf32, #tpu.memory_space<vmem>>, %arg2: memref<32x128xf32, #tpu.memory_space<vmem>>, %arg3: memref<1x128xf32, #tpu.memory_space<vmem>>, %arg4: memref<128x64xf32, #tpu.memory_space<vmem>>, %arg5: memref<1x64xf32, #tpu.memory_space<vmem>>, %arg6: memref<64x16xf32, #tpu.memory_space<vmem>>, %arg7: memref<1x16xf32, #tpu.memory_space<vmem>>, %arg8: memref<128x16xf32, #tpu.memory_space<vmem>>) attributes {dimension_semantics = [#tpu.dimension_semantics<parallel>], iteration_bounds = array<i64: 2>, scalar_prefetch = 0 : i64, scratch_operands = 0 : i64, tpu.core_type = #tpu.core_type<tc>, window_params = [{transform_indices = @transform_0, window_bounds = array<i64: 128, 32>}, {pipeline_mode = #tpu.pipeline_mode<synchronous>, transform_indices = @transform_1, window_bounds = array<i64: 32, 128>}, {pipeline_mode = #tpu.pipeline_mode<synchronous>, transform_indices = @transform_2, window_bounds = array<i64: 1, 128>}, {pipeline_mode = #tpu.pipeline_mode<synchronous>, transform_indices = @transform_3, window_bounds = array<i64: 128, 64>}, {pipeline_mode = #tpu.pipeline_mode<synchronous>, transform_indices = @transform_4, window_bounds = array<i64: 1, 64>}, {pipeline_mode = #tpu.pipeline_mode<synchronous>, transform_indices = @transform_5, window_bounds = array<i64: 64, 16>}, {pipeline_mode = #tpu.pipeline_mode<synchronous>, transform_indices = @transform_6, window_bounds = array<i64: 1, 16>}, {transform_indices = @transform_7, window_bounds = array<i64: 128, 16>}]} {
    %c0 = arith.constant 0 : index
    %c0_0 = arith.constant 0 : index
    %0 = vector.load %arg1[%c0, %c0_0] : memref<128x32xf32, #tpu.memory_space<vmem>>, vector<128x32xf32>
    %1 = arith.truncf %0 : vector<128x32xf32> to vector<128x32xbf16>
    %c0_1 = arith.constant 0 : index
    %c0_2 = arith.constant 0 : index
    %2 = vector.load %arg2[%c0_1, %c0_2] : memref<32x128xf32, #tpu.memory_space<vmem>>, vector<32x128xf32>
    %3 = arith.truncf %2 : vector<32x128xf32> to vector<32x128xbf16>
    %cst = arith.constant dense<0.000000e+00> : vector<128x128xf32>
    %4 = tpu.matmul %1, %3, %cst {dimension_numbers = #tpu.dot_dimension_numbers<[1], [0], [0], [1], [0, 0, 1, 1], [], []>} : vector<128x32xbf16>, vector<32x128xbf16>, vector<128x128xf32> -> vector<128x128xf32>
    %c0_3 = arith.constant 0 : index
    %c0_4 = arith.constant 0 : index
    %5 = vector.load %arg3[%c0_3, %c0_4] : memref<1x128xf32, #tpu.memory_space<vmem>>, vector<1x128xf32>
    %6 = vector.broadcast %5 : vector<1x128xf32> to vector<128x128xf32>
    %7 = arith.addf %4, %6 : vector<128x128xf32>
    %cst_5 = arith.constant 0.000000e+00 : f32
    %8 = vector.broadcast %cst_5 : f32 to vector<128x128xf32>
    %9 = arith.maximumf %7, %8 : vector<128x128xf32>
    %10 = arith.truncf %9 : vector<128x128xf32> to vector<128x128xbf16>
    %c0_6 = arith.constant 0 : index
    %c0_7 = arith.constant 0 : index
    %11 = vector.load %arg4[%c0_6, %c0_7] : memref<128x64xf32, #tpu.memory_space<vmem>>, vector<128x64xf32>
    %12 = arith.truncf %11 : vector<128x64xf32> to vector<128x64xbf16>
    %cst_8 = arith.constant dense<0.000000e+00> : vector<128x64xf32>
    %13 = tpu.matmul %10, %12, %cst_8 {dimension_numbers = #tpu.dot_dimension_numbers<[1], [0], [0], [1], [0, 0, 1, 1], [], []>} : vector<128x128xbf16>, vector<128x64xbf16>, vector<128x64xf32> -> vector<128x64xf32>
    %c0_9 = arith.constant 0 : index
    %c0_10 = arith.constant 0 : index
    %14 = vector.load %arg5[%c0_9, %c0_10] : memref<1x64xf32, #tpu.memory_space<vmem>>, vector<1x64xf32>
    %15 = vector.broadcast %14 : vector<1x64xf32> to vector<128x64xf32>
    %16 = arith.addf %13, %15 : vector<128x64xf32>
    %cst_11 = arith.constant 0.000000e+00 : f32
    %17 = vector.broadcast %cst_11 : f32 to vector<128x64xf32>
    %18 = arith.maximumf %16, %17 : vector<128x64xf32>
    %19 = arith.truncf %18 : vector<128x64xf32> to vector<128x64xbf16>
    %c0_12 = arith.constant 0 : index
    %c0_13 = arith.constant 0 : index
    %20 = vector.load %arg6[%c0_12, %c0_13] : memref<64x16xf32, #tpu.memory_space<vmem>>, vector<64x16xf32>
    %21 = arith.truncf %20 : vector<64x16xf32> to vector<64x16xbf16>
    %cst_14 = arith.constant dense<0.000000e+00> : vector<128x16xf32>
    %22 = tpu.matmul %19, %21, %cst_14 {dimension_numbers = #tpu.dot_dimension_numbers<[1], [0], [0], [1], [0, 0, 1, 1], [], []>} : vector<128x64xbf16>, vector<64x16xbf16>, vector<128x16xf32> -> vector<128x16xf32>
    %c0_15 = arith.constant 0 : index
    %c0_16 = arith.constant 0 : index
    %23 = vector.load %arg7[%c0_15, %c0_16] : memref<1x16xf32, #tpu.memory_space<vmem>>, vector<1x16xf32>
    %24 = vector.broadcast %23 : vector<1x16xf32> to vector<128x16xf32>
    %25 = arith.addf %22, %24 : vector<128x16xf32>
    %c0_17 = arith.constant 0 : index
    %c0_18 = arith.constant 0 : index
    %26 = vector.load %arg8[%c0_17, %c0_18] : memref<128x16xf32, #tpu.memory_space<vmem>>, vector<128x16xf32>
    tpu.vector_store %arg8[%c0_17, %c0_18], %25 {strides = array<i32>} : memref<128x16xf32, #tpu.memory_space<vmem>>, vector<128x16xf32>,
    return
  }
  func.func @transform_0(%arg0: i32) -> (i32, i32) {
    %c0_i32 = arith.constant 0 : i32
    %c0_i32_0 = arith.constant 0 : i32
    return %arg0, %c0_i32 : i32, i32
  }
  func.func @transform_1(%arg0: i32) -> (i32, i32) {
    %c0_i32 = arith.constant 0 : i32
    %c0_i32_0 = arith.constant 0 : i32
    %c0_i32_1 = arith.constant 0 : i32
    return %c0_i32, %c0_i32_0 : i32, i32
  }
  func.func @transform_2(%arg0: i32) -> (i32, i32) {
    %c0_i32 = arith.constant 0 : i32
    %c0_i32_0 = arith.constant 0 : i32
    %c0_i32_1 = arith.constant 0 : i32
    return %c0_i32, %c0_i32_0 : i32, i32
  }
  func.func @transform_3(%arg0: i32) -> (i32, i32) {
    %c0_i32 = arith.constant 0 : i32
    %c0_i32_0 = arith.constant 0 : i32
    %c0_i32_1 = arith.constant 0 : i32
    return %c0_i32, %c0_i32_0 : i32, i32
  }
  func.func @transform_4(%arg0: i32) -> (i32, i32) {
    %c0_i32 = arith.constant 0 : i32
    %c0_i32_0 = arith.constant 0 : i32
    %c0_i32_1 = arith.constant 0 : i32
    return %c0_i32, %c0_i32_0 : i32, i32
  }
  func.func @transform_5(%arg0: i32) -> (i32, i32) {
    %c0_i32 = arith.constant 0 : i32
    %c0_i32_0 = arith.constant 0 : i32
    %c0_i32_1 = arith.constant 0 : i32
    return %c0_i32, %c0_i32_0 : i32, i32
  }
  func.func @transform_6(%arg0: i32) -> (i32, i32) {
    %c0_i32 = arith.constant 0 : i32
    %c0_i32_0 = arith.constant 0 : i32
    %c0_i32_1 = arith.constant 0 : i32
    return %c0_i32, %c0_i32_0 : i32, i32
  }
  func.func @transform_7(%arg0: i32) -> (i32, i32) {
    %c0_i32 = arith.constant 0 : i32
    %c0_i32_0 = arith.constant 0 : i32
    return %arg0, %c0_i32 : i32, i32
  }
}

</mosaic_0001>

<bundles_post_ra>
// kernel: tpu_custom_call.1
= control target key start
LH: loop header
LB: loop body
LE: loop exit
PB: predicated region body
PF: predicated region fallthrough
CT: control target
= control target key end

     0   :  { %s1032_s24 = smov 0   ;;  %s1217_s0 = inlined_call_operand.vmem [shape: f32[256,32], index: 0, kind: input, shape index: {}]   ;;  %s1218_s1 = inlined_call_operand.vmem [shape: f32[32,128], index: 1, kind: input, shape index: {}]   ;;  %s1219_s2 = inlined_call_operand.vmem [shape: f32[1,128], index: 2, kind: input, shape index: {}]   ;;  %s1220_s3 = inlined_call_operand.vmem [shape: f32[128,64], index: 3, kind: input, shape index: {}]   ;;  %s1221_s4 = inlined_call_operand.vmem [shape: f32[1,64], index: 4, kind: input, shape index: {}]   ;;  %s1222_s5 = inlined_call_operand.vmem [shape: f32[64,16], index: 5, kind: input, shape index: {}]   ;;  %s1223_s6 = inlined_call_operand.vmem [shape: f32[1,16], index: 6, kind: input, shape index: {}]   ;;  %s1224_s7 = inlined_call_operand.vmem [shape: f32[256,16], index: 7, kind: output, shape index: {}]  }
   0x1 LB: > { %s832_s25 = sadd.s32 4294967295, %s990_s24   ;;  %p836_p0 = scmp.ge.s32.totalorder %s990_s24, 1  ;;  %s990_s24 = sphi %s1032_s24, %s17_s24  }
   0x2   : > { %p238_p1 = scmp.lt.s32.totalorder %s990_s24, 3 }
   0x4   : > { %p239_p2 = pnand %p836_p0, %p238_p1 }
   0x5   : > { %v307_v0 = vld [vmem:[%s1218_s1] sm:$0xff] (!%p239_p2)  ;;  %v308_v1 = vld [vmem:[%s1218_s1 + $0x8] sm:$0xff] (!%p239_p2)  ;;  %v309_v2 = vld [vmem:[%s1218_s1 + $0x10] sm:$0xff] (!%p239_p2)  ;;  %s837_s9 = sshll.u32 (!%p239_p2), %s832_s25, 4  ;;  %vm320_vm0 = vcmask (!%p239_p2), 261120   ;;  %vm637_vm1 = vcmask (!%p239_p2), 523264  }
   0x6   : > { %242 = sbr.rel (%p239_p2) target bundleno = 706 (0x2c2), region = 48  ;;  %v311_v3 = vpack.c.bf16 (!%p239_p2), %v308_v1, %v307_v0  ;;  %v310_v4 = vld [vmem:[%s1218_s1 + $0x18] sm:$0xff] (!%p239_p2)  ;;  %p271_p3 = scmp.lt.s32.totalorder (!%p239_p2), %s837_s9, 31  ;;  %v466_v5 = vld [vmem:[%s1220_s3] sm:$0xff] (!%p239_p2)  ;;  %v467_v6 = vld [vmem:[%s1220_s3 + $0x8] sm:$0xff] (!%p239_p2)  ;;  %vm759_vm2 = vcmask (!%p239_p2), 130048  }
   0x7   : > { %v312_v7 = vpack.c.bf16 (!%p239_p2), %v310_v4, %v309_v2  ;;  %v482_v8 = vpack.c.bf16 (!%p239_p2), %v467_v6, %v466_v5  ;;  %v468_v9 = vld [vmem:[%s1220_s3 + $0x10] sm:$0xff] (!%p239_p2)  ;;  %v469_v10 = vld [vmem:[%s1220_s3 + $0x18] sm:$0xff] (!%p239_p2)  ;;  %v470_v12 = vld [vmem:[%s1220_s3 + $0x20] sm:$0xff] (!%p239_p2) }
   0x8   : > { %900 = vmatprep.subr.bf16.mxu0 (!%p239_p2), %v311_v3  ;;  %v483_v11 = vpack.c.bf16 (!%p239_p2), %v469_v10, %v468_v9  ;;  %v471_v13 = vld [vmem:[%s1220_s3 + $0x28] sm:$0xff] (!%p239_p2)  ;;  %v472_v15 = vld [vmem:[%s1220_s3 + $0x30] sm:$0xff] (!%p239_p2)  ;;  %v473_v16 = vld [vmem:[%s1220_s3 + $0x38] sm:$0xff] (!%p239_p2) }
   0x9   : > { %901 = vmatpush3.bf16.msra.mxu0 (!%p239_p2), %v311_v3  ;;  %920 = vmatprep.subr.bf16.mxu1 (!%p239_p2), %v482_v8  ;;  %v484_v14 = vpack.c.bf16 (!%p239_p2), %v471_v13, %v470_v12  ;;  %v485_v26 = vpack.c.bf16 (!%p239_p2), %v473_v16, %v472_v15  ;;  %v474_v27 = vld [vmem:[%s1220_s3 + $0x40] sm:$0xff] (!%p239_p2)  ;;  %v475_v28 = vld [vmem:[%s1220_s3 + $0x48] sm:$0xff] (!%p239_p2)  ;;  %v476_v35 = vld [vmem:[%s1220_s3 + $0x50] sm:$0xff] (!%p239_p2) }
   0xa   : > { %902 = vmatprep.subr.bf16.mxu0 (!%p239_p2), %v312_v7  ;;  %921 = vmatpush3.bf16.msra.mxu1 (!%p239_p2), %v482_v8  ;;  %v486_v33 = vpack.c.bf16 (!%p239_p2), %v475_v28, %v474_v27  ;;  %v477_v36 = vld [vmem:[%s1220_s3 + $0x58] sm:$0xff] (!%p239_p2)  ;;  %v478_v48 = vld [vmem:[%s1220_s3 + $0x60] sm:$0xff] (!%p239_p2)  ;;  %v479_v49 = vld [vmem:[%s1220_s3 + $0x68] sm:$0xff] (!%p239_p2) }
   0xb   : > { %922 = vmatprep.subr.bf16.mxu1 (!%p239_p2), %v483_v11  ;;  %v487_v38 = vpack.c.bf16 (!%p239_p2), %v477_v36, %v476_v35  ;;  %v488_v50 = vpack.c.bf16 (!%p239_p2), %v479_v49, %v478_v48  ;;  %v480_v51 = vld [vmem:[%s1220_s3 + $0x70] sm:$0xff] (!%p239_p2)  ;;  %v481_v52 = vld [vmem:[%s1220_s3 + $0x78] sm:$0xff] (!%p239_p2)  ;;  %v618_v54 = vld [vmem:[%s1222_s5] sm:$0xff] (!%p239_p2) }
   0xc   : > { %v489_v53 = vpack.c.bf16 (!%p239_p2), %v481_v52, %v480_v51  ;;  %v619_v55 = vld [vmem:[%s1222_s5 + $0x8] sm:$0xff] (!%p239_p2)  ;;  %v620_v56 = vld [vmem:[%s1222_s5 + $0x10] sm:$0xff] (!%p239_p2)  ;;  %v621_v58 = vld [vmem:[%s1222_s5 + $0x18] sm:$0xff] (!%p239_p2) }
   0xd   : > { %s1226_s9 = smov (!%p271_p3, %s837_s9), 31  ;;  %903 = vmatpush3.bf16.msra.mxu0 %v312_v7  ;;  %v626_v57 = vpack.c.bf16 %v619_v55, %v618_v54  ;;  %v627_v59 = vpack.c.bf16 %v621_v58, %v620_v56  ;;  %v622_v60 = vld [vmem:[%s1222_s5 + $0x20] sm:$0xff]  ;;  %v623_v61 = vld [vmem:[%s1222_s5 + $0x28] sm:$0xff]  ;;  %v624_v56 = vld [vmem:[%s1222_s5 + $0x30] sm:$0xff] }
   0xe   : > { %s838_s25 = sshll.u32 %s1226_s9, 3  ;;  %923 = vmatpush3.bf16.msra.mxu1 %v483_v11  ;;  %v628_v62 = vpack.c.bf16 %v623_v61, %v622_v60  ;;  %v841_v63 = vld [vmem:[%s1219_s2] ss:$0 sm:$0xff] }
   0xf   : > { %s1078_s28 = scalar_lea.vmem %s1217_s0, %s838_s25  ;;  %924 = vmatprep.subr.bf16.mxu1 %v484_v14  ;;  %952 = vmatprep.subr.bf16.mxu0 %v626_v57  ;;  %s1180_s11 = scalar_lea.vmem %s1224_s7, %s838_s25 }
  0x10   : > { %v283_v17 = vld [vmem:[%s1078_s28] sm:$0xff]  ;;  %v284_v18 = vld [vmem:[%s1078_s28 + $0x8] sm:$0xff]  ;;  %v285_v19 = vld [vmem:[%s1078_s28 + $0x10] sm:$0xff] }
  0x11   : > { %v299_v20 = vpack.c.bf16 %v284_v18, %v283_v17  ;;  %v286_v21 = vld [vmem:[%s1078_s28 + $0x18] sm:$0xff]  ;;  %v287_v22 = vld [vmem:[%s1078_s28 + $0x20] sm:$0xff]  ;;  %v288_v23 = vld [vmem:[%s1078_s28 + $0x28] sm:$0xff] }
  0x12   : > { %v300_v24 = vpack.c.bf16 %v286_v21, %v285_v19  ;;  %v301_v25 = vpack.c.bf16 %v288_v23, %v287_v22  ;;  %v289_v29 = vld [vmem:[%s1078_s28 + $0x30] sm:$0xff]  ;;  %v290_v30 = vld [vmem:[%s1078_s28 + $0x38] sm:$0xff]  ;;  %v291_v31 = vld [vmem:[%s1078_s28 + $0x40] sm:$0xff]  ;;  %925 = vmatpush3.bf16.msra.mxu1 %v484_v14 }
  0x13   : > { %904 = vmatprep.mubr.msk.bf16.mxu0 %vm320_vm0, %v299_v20  ;;  %v292_v32 = vld [vmem:[%s1078_s28 + $0x48] sm:$0xff]  ;;  %926 = vmatprep.subr.bf16.mxu1 %v485_v26  ;;  %v302_v34 = vpack.c.bf16 %v290_v30, %v289_v29  ;;  %v293_v39 = vld [vmem:[%s1078_s28 + $0x50] sm:$0xff]  ;;  %v294_v40 = vld [vmem:[%s1078_s28 + $0x58] sm:$0xff] }
  0x14   : > { %905 = vmatmul.mubr.msk.bf16.vlgmr.msra.gmra.mrb[0].mxu0 %vm320_vm0, %v300_v24  ;;  %v303_v37 = vpack.c.bf16 %v292_v32, %v291_v31  ;;  %v295_v41 = vld [vmem:[%s1078_s28 + $0x60] sm:$0xff]  ;;  %v296_v42 = vld [vmem:[%s1078_s28 + $0x68] sm:$0xff]  ;;  %v304_v43 = vpack.c.bf16 %v294_v40, %v293_v39  ;;  %v297_v45 = vld [vmem:[%s1078_s28 + $0x70] sm:$0xff] }
  0x15   : > { %908 = vmatprep.mubr.msk.bf16.mxu0 %vm320_vm0, %v301_v25  ;;  %v305_v44 = vpack.c.bf16 %v296_v42, %v295_v41  ;;  %v298_v46 = vld [vmem:[%s1078_s28 + $0x78] sm:$0xff]  ;;  %953 = vmatpush3.bf16.msra.mxu0 %v626_v57 }
  0x16   : > { %927 = vmatpush3.bf16.msra.mxu1 %v485_v26  ;;  %v306_v47 = vpack.c.bf16 %v298_v46, %v297_v45  ;;  %954 = vmatprep.subr.bf16.mxu0 %v627_v59  ;;  %v625_v57 = vld [vmem:[%s1222_s5 + $0x38] sm:$0xff] }
  0x17   : > { %928 = vmatprep.subr.bf16.mxu1 %v486_v33  ;;  %v629_v58 = vpack.c.bf16 %v625_v57, %v624_v56 }
  0x19   : > { %955 = vmatpush3.bf16.msra.mxu0 %v627_v59  ;;  %v850_v59 = vld [vmem:[%s1221_s4] ss:$0 sm:$0xff] }
  0x1a   : > { %929 = vmatpush3.bf16.msra.mxu1 %v486_v33  ;;  %956 = vmatprep.subr.bf16.mxu0 %v628_v62 }
  0x1b   : > { %930 = vmatprep.subr.bf16.mxu1 %v487_v38 }
  0x1c   : > { %909 = vmatmul.mubr.msk.bf16.gmra.mrb[4].mxu0 %vm320_vm0, %v302_v34 }
  0x1d   : > { %912 = vmatprep.mubr.msk.bf16.mxu0 %vm320_vm0, %v303_v37  ;;  %957 = vmatpush3.bf16.msra.mxu0 %v628_v62 }
  0x1e   : > { %931 = vmatpush3.bf16.msra.mxu1 %v487_v38  ;;  %958 = vmatprep.subr.bf16.mxu0 %v629_v58 }
  0x1f   : > { %932 = vmatprep.subr.bf16.mxu1 %v488_v50 }
  0x21   : > { %959 = vmatpush3.bf16.msra.mxu0 %v629_v58 }
  0x22   : > { %933 = vmatpush3.bf16.msra.mxu1 %v488_v50 }
  0x23   : > { %934 = vmatprep.subr.bf16.mxu1 %v489_v53 }
  0x24   : > { %913 = vmatmul.mubr.msk.bf16.gmra.mrb[8].mxu0 %vm320_vm0, %v304_v43 }
  0x25   : > { %916 = vmatprep.mubr.msk.bf16.mxu0 %vm320_vm0, %v305_v44 }
  0x26   : > { %935 = vmatpush3.bf16.msra.mxu1 %v489_v53 }
  0x2c   : > { %917 = vmatmul.mubr.msk.bf16.gmra.mrb[12].mxu0 %vm320_vm0, %v306_v47 }
  0xe7   : > { %v906_v0 = vpop.f32.mrb[0].mxu0 }
  0xe8   : > { %v388_v1 = vadd.f32 %v906_v0, %v841_v63  ;;  %v379_v2 = vpop.f32.mrb[1].mxu0 }
  0xe9   : > { %v380_v3 = vadd.f32 %v841_v63, %v379_v2  ;;  %v907_v4 = vpop.f32.mrb[2].mxu0 }
  0xea   : > { %v391_v5 = vadd.f32 %v907_v4, %v841_v63  ;;  %v382_v6 = vpop.f32.mrb[3].mxu0  ;;  %v444_v8 = vmax.f32 %v388_v1, 0.0 }
  0xeb   : > { %v383_v7 = vadd.f32 %v841_v63, %v382_v6  ;;  %v442_v10 = vmax.f32 %v380_v3, 0.0 }
  0xec   : > { %v445_v9 = vmax.f32 %v391_v5, 0.0 }
  0xed   : > { %v443_v11 = vmax.f32 %v383_v7, 0.0 }
  0xee   : > { %v459_v12 = vpack.c.bf16 %v445_v9, %v444_v8 }
  0xef   : > { %v910_v13 = vpop.f32.mrb[4].mxu0  ;;  %v458_v14 = vpack.c.bf16 %v443_v11, %v442_v10 }
  0xf0   : > { %v404_v15 = vadd.f32 %v910_v13, %v841_v63  ;;  %v395_v16 = vpop.f32.mrb[5].mxu0 }
  0xf1   : > { %v396_v17 = vadd.f32 %v841_v63, %v395_v16  ;;  %v911_v18 = vpop.f32.mrb[6].mxu0  ;;  %936 = vmatprep.mubr.bf16.mxu1 %v458_v14 }
  0xf2   : > { %v407_v19 = vadd.f32 %v911_v18, %v841_v63  ;;  %v398_v20 = vpop.f32.mrb[7].mxu0  ;;  %937 = vmatmul.mubr.bf16.vlgmr.msra.gmra.mrb[0].mxu1 %v459_v12  ;;  %v448_v22 = vmax.f32 %v404_v15, 0.0 }
  0xf3   : > { %v399_v21 = vadd.f32 %v841_v63, %v398_v20  ;;  %v446_v24 = vmax.f32 %v396_v17, 0.0 }
  0xf4   : > { %v449_v23 = vmax.f32 %v407_v19, 0.0 }
  0xf5   : > { %v447_v25 = vmax.f32 %v399_v21, 0.0 }
  0xf6   : > { %v461_v26 = vpack.c.bf16 %v449_v23, %v448_v22 }
  0xf7   : > { %v460_v27 = vpack.c.bf16 %v447_v25, %v446_v24  ;;  %v914_v28 = vpop.f32.mrb[8].mxu0 }
  0xf8   : > { %v420_v29 = vadd.f32 %v914_v28, %v841_v63  ;;  %v411_v30 = vpop.f32.mrb[9].mxu0 }
  0xf9   : > { %v412_v31 = vadd.f32 %v841_v63, %v411_v30  ;;  %v915_v32 = vpop.f32.mrb[10].mxu0  ;;  %940 = vmatprep.mubr.bf16.mxu1 %v460_v27 }
  0xfa   : > { %v423_v33 = vadd.f32 %v915_v32, %v841_v63  ;;  %v414_v34 = vpop.f32.mrb[11].mxu0  ;;  %941 = vmatmul.mubr.bf16.gmra.mrb[4].mxu1 %v461_v26  ;;  %v452_v36 = vmax.f32 %v420_v29, 0.0 }
  0xfb   : > { %v415_v35 = vadd.f32 %v841_v63, %v414_v34  ;;  %v450_v38 = vmax.f32 %v412_v31, 0.0 }
  0xfc   : > { %v453_v37 = vmax.f32 %v423_v33, 0.0 }
  0xfd   : > { %v451_v39 = vmax.f32 %v415_v35, 0.0 }
  0xfe   : > { %v463_v40 = vpack.c.bf16 %v453_v37, %v452_v36 }
  0xff   : > { %v462_v41 = vpack.c.bf16 %v451_v39, %v450_v38  ;;  %v918_v42 = vpop.f32.mrb[12].mxu0 }
 0x100   : > { %v436_v43 = vadd.f32 %v918_v42, %v841_v63  ;;  %v427_v44 = vpop.f32.mrb[13].mxu0 }
 0x101   : > { %v428_v45 = vadd.f32 %v841_v63, %v427_v44  ;;  %v919_v46 = vpop.f32.mrb[14].mxu0  ;;  %944 = vmatprep.mubr.bf16.mxu1 %v462_v41 }
 0x102   : > { %v439_v47 = vadd.f32 %v919_v46, %v841_v63  ;;  %v430_v48 = vpop.f32.mrb[15].mxu0  ;;  %945 = vmatmul.mubr.bf16.gmra.mrb[8].mxu1 %v463_v40  ;;  %v456_v50 = vmax.f32 %v436_v43, 0.0 }
 0x103   : > { %v431_v49 = vadd.f32 %v841_v63, %v430_v48  ;;  %v454_v52 = vmax.f32 %v428_v45, 0.0 }
 0x104   : > { %v457_v51 = vmax.f32 %v439_v47, 0.0 }
 0x105   : > { %v455_v53 = vmax.f32 %v431_v49, 0.0 }
 0x106   : > { %v465_v54 = vpack.c.bf16 %v457_v51, %v456_v50 }
 0x107   : > { %v464_v55 = vpack.c.bf16 %v455_v53, %v454_v52  ;;  %v851_v52 = vld [vmem:[%s1223_s6] ss:$0 sm:$0xff] }
 0x109   : > { %948 = vmatprep.mubr.bf16.mxu1 %v464_v55 }
 0x10a   : > { %949 = vmatmul.mubr.bf16.gmra.mrb[12].mxu1 %v465_v54 }
 0x1c5   : > { %v938_v60 = vpop.f32.mrb[0].mxu1 }
 0x1c6   : > { %v540_v61 = vadd.f32 %v938_v60, %v850_v59  ;;  %v531_v62 = vpop.f32.mrb[1].mxu1 }
 0x1c7   : > { %v532_v63 = vadd.f32 %v850_v59, %v531_v62  ;;  %v939_v0 = vpop.f32.mrb[2].mxu1 }
 0x1c8   : > { %v543_v1 = vadd.f32 %v939_v0, %v850_v59  ;;  %v534_v2 = vpop.f32.mrb[3].mxu1  ;;  %v596_v4 = vmax.f32 %v540_v61, 0.0 }
 0x1c9   : > { %v535_v3 = vadd.f32 %v850_v59, %v534_v2  ;;  %v594_v6 = vmax.f32 %v532_v63, 0.0 }
 0x1ca   : > { %v597_v5 = vmax.f32 %v543_v1, 0.0 }
 0x1cb   : > { %v595_v7 = vmax.f32 %v535_v3, 0.0 }
 0x1cc   : > { %v611_v8 = vpack.c.bf16 %v597_v5, %v596_v4 }
 0x1cd   : > { %v610_v9 = vpack.c.bf16 %v595_v7, %v594_v6  ;;  %v942_v10 = vpop.f32.mrb[4].mxu1 }
 0x1ce   : > { %v556_v11 = vadd.f32 %v942_v10, %v850_v59  ;;  %v547_v12 = vpop.f32.mrb[5].mxu1 }
 0x1cf   : > { %v548_v13 = vadd.f32 %v850_v59, %v547_v12  ;;  %v943_v14 = vpop.f32.mrb[6].mxu1  ;;  %960 = vmatprep.mubr.msk.bf16.mxu0 %vm637_vm1, %v610_v9 }
 0x1d0   : > { %v559_v15 = vadd.f32 %v943_v14, %v850_v59  ;;  %v550_v16 = vpop.f32.mrb[7].mxu1  ;;  %961 = vmatmul.mubr.msk.bf16.vlgmr.msra.gmra.mrb[16].mxu0 %vm637_vm1, %v611_v8  ;;  %v600_v18 = vmax.f32 %v556_v11, 0.0 }
 0x1d1   : > { %v551_v17 = vadd.f32 %v850_v59, %v550_v16  ;;  %v598_v20 = vmax.f32 %v548_v13, 0.0 }
 0x1d2   : > { %v601_v19 = vmax.f32 %v559_v15, 0.0 }
 0x1d3   : > { %v599_v21 = vmax.f32 %v551_v17, 0.0 }
 0x1d4   : > { %v613_v22 = vpack.c.bf16 %v601_v19, %v600_v18 }
 0x1d5   : > { %v612_v23 = vpack.c.bf16 %v599_v21, %v598_v20  ;;  %v946_v24 = vpop.f32.mrb[8].mxu1 }
 0x1d6   : > { %v572_v25 = vadd.f32 %v946_v24, %v850_v59  ;;  %v563_v26 = vpop.f32.mrb[9].mxu1 }
 0x1d7   : > { %v564_v27 = vadd.f32 %v850_v59, %v563_v26  ;;  %v947_v28 = vpop.f32.mrb[10].mxu1  ;;  %964 = vmatprep.mubr.msk.bf16.mxu0 %vm637_vm1, %v612_v23 }
 0x1d8   : > { %v575_v29 = vadd.f32 %v947_v28, %v850_v59  ;;  %v566_v30 = vpop.f32.mrb[11].mxu1  ;;  %965 = vmatmul.mubr.msk.bf16.gmra.mrb[20].mxu0 %vm637_vm1, %v613_v22  ;;  %v604_v32 = vmax.f32 %v572_v25, 0.0 }
 0x1d9   : > { %v567_v31 = vadd.f32 %v850_v59, %v566_v30  ;;  %v602_v34 = vmax.f32 %v564_v27, 0.0 }
 0x1da   : > { %v605_v33 = vmax.f32 %v575_v29, 0.0 }
 0x1db   : > { %v603_v35 = vmax.f32 %v567_v31, 0.0 }
 0x1dc   : > { %v615_v36 = vpack.c.bf16 %v605_v33, %v604_v32 }
 0x1dd   : > { %v614_v37 = vpack.c.bf16 %v603_v35, %v602_v34  ;;  %v950_v38 = vpop.f32.mrb[12].mxu1 }
 0x1de   : > { %v588_v39 = vadd.f32 %v950_v38, %v850_v59  ;;  %v579_v40 = vpop.f32.mrb[13].mxu1 }
 0x1df   : > { %v580_v41 = vadd.f32 %v850_v59, %v579_v40  ;;  %v951_v42 = vpop.f32.mrb[14].mxu1  ;;  %968 = vmatprep.mubr.msk.bf16.mxu0 %vm637_vm1, %v614_v37 }
 0x1e0   : > { %v591_v43 = vadd.f32 %v951_v42, %v850_v59  ;;  %v582_v44 = vpop.f32.mrb[15].mxu1  ;;  %969 = vmatmul.mubr.msk.bf16.gmra.mrb[24].mxu0 %vm637_vm1, %v615_v36  ;;  %v608_v46 = vmax.f32 %v588_v39, 0.0 }
 0x1e1   : > { %v583_v45 = vadd.f32 %v850_v59, %v582_v44  ;;  %v606_v48 = vmax.f32 %v580_v41, 0.0 }
 0x1e2   : > { %v609_v47 = vmax.f32 %v591_v43, 0.0 }
 0x1e3   : > { %v607_v49 = vmax.f32 %v583_v45, 0.0 }
 0x1e4   : > { %v617_v50 = vpack.c.bf16 %v609_v47, %v608_v46 }
 0x1e5   : > { %v616_v51 = vpack.c.bf16 %v607_v49, %v606_v48 }
 0x1e7   : > { %972 = vmatprep.mubr.msk.bf16.mxu0 %vm637_vm1, %v616_v51 }
 0x1e8   : > { %973 = vmatmul.mubr.msk.bf16.gmra.mrb[28].mxu0 %vm637_vm1, %v617_v50 }
 0x2a3   : > { %v962_v53 = vpop.f32.mrb[16].mxu0 }
 0x2a4   : > { %v705_v54 = vadd.f32 %v962_v53, %v851_v52  ;;  %v696_v55 = vpop.f32.mrb[17].mxu0 }
 0x2a5   : > { %v697_v56 = vadd.f32 %v851_v52, %v696_v55  ;;  %v963_v57 = vpop.f32.mrb[18].mxu0 }
 0x2a6   : > { %762 = vst.msk [vmem:[%s1180_s11 + $0x10] sm:$0xff] %vm759_vm2, %v705_v54  ;;  %v708_v58 = vadd.f32 %v963_v57, %v851_v52  ;;  %v699_v59 = vpop.f32.mrb[19].mxu0 }
 0x2a7   : > { %760 = vst.msk [vmem:[%s1180_s11] sm:$0xff] %vm759_vm2, %v697_v56  ;;  %v700_v60 = vadd.f32 %v851_v52, %v699_v59 }
 0x2a8   : > { %763 = vst.msk [vmem:[%s1180_s11 + $0x18] sm:$0xff] %vm759_vm2, %v708_v58 }
 0x2a9   : > { %761 = vst.msk [vmem:[%s1180_s11 + $0x8] sm:$0xff] %vm759_vm2, %v700_v60 }
 0x2ab   : > { %v966_v61 = vpop.f32.mrb[20].mxu0 }
 0x2ac   : > { %v721_v62 = vadd.f32 %v966_v61, %v851_v52  ;;  %v712_v63 = vpop.f32.mrb[21].mxu0 }
 0x2ad   : > { %v713_v0 = vadd.f32 %v851_v52, %v712_v63  ;;  %v967_v1 = vpop.f32.mrb[22].mxu0 }
 0x2ae   : > { %766 = vst.msk [vmem:[%s1180_s11 + $0x30] sm:$0xff] %vm759_vm2, %v721_v62  ;;  %v724_v2 = vadd.f32 %v967_v1, %v851_v52  ;;  %v715_v3 = vpop.f32.mrb[23].mxu0 }
 0x2af   : > { %764 = vst.msk [vmem:[%s1180_s11 + $0x20] sm:$0xff] %vm759_vm2, %v713_v0  ;;  %v716_v4 = vadd.f32 %v851_v52, %v715_v3 }
 0x2b0   : > { %767 = vst.msk [vmem:[%s1180_s11 + $0x38] sm:$0xff] %vm759_vm2, %v724_v2 }
 0x2b1   : > { %765 = vst.msk [vmem:[%s1180_s11 + $0x28] sm:$0xff] %vm759_vm2, %v716_v4 }
 0x2b3   : > { %v970_v5 = vpop.f32.mrb[24].mxu0 }
 0x2b4   : > { %v737_v6 = vadd.f32 %v970_v5, %v851_v52  ;;  %v728_v7 = vpop.f32.mrb[25].mxu0 }
 0x2b5   : > { %v729_v8 = vadd.f32 %v851_v52, %v728_v7  ;;  %v971_v9 = vpop.f32.mrb[26].mxu0 }
 0x2b6   : > { %770 = vst.msk [vmem:[%s1180_s11 + $0x50] sm:$0xff] %vm759_vm2, %v737_v6  ;;  %v740_v10 = vadd.f32 %v971_v9, %v851_v52  ;;  %v731_v11 = vpop.f32.mrb[27].mxu0 }
 0x2b7   : > { %768 = vst.msk [vmem:[%s1180_s11 + $0x40] sm:$0xff] %vm759_vm2, %v729_v8  ;;  %v732_v12 = vadd.f32 %v851_v52, %v731_v11 }
 0x2b8   : > { %771 = vst.msk [vmem:[%s1180_s11 + $0x58] sm:$0xff] %vm759_vm2, %v740_v10 }
 0x2b9   : > { %769 = vst.msk [vmem:[%s1180_s11 + $0x48] sm:$0xff] %vm759_vm2, %v732_v12 }
 0x2bb   : > { %v974_v13 = vpop.f32.mrb[28].mxu0 }
 0x2bc   : > { %v753_v14 = vadd.f32 %v974_v13, %v851_v52  ;;  %v744_v15 = vpop.f32.mrb[29].mxu0 }
 0x2bd   : > { %v745_v16 = vadd.f32 %v851_v52, %v744_v15  ;;  %v975_v17 = vpop.f32.mrb[30].mxu0 }
 0x2be   : > { %774 = vst.msk [vmem:[%s1180_s11 + $0x70] sm:$0xff] %vm759_vm2, %v753_v14  ;;  %v756_v18 = vadd.f32 %v975_v17, %v851_v52  ;;  %v747_v19 = vpop.f32.mrb[31].mxu0 }
 0x2bf   : > { %772 = vst.msk [vmem:[%s1180_s11 + $0x60] sm:$0xff] %vm759_vm2, %v745_v16  ;;  %v748_v20 = vadd.f32 %v851_v52, %v747_v19 }
 0x2c0   : > { %775 = vst.msk [vmem:[%s1180_s11 + $0x78] sm:$0xff] %vm759_vm2, %v756_v18 }
 0x2c1   : > { %773 = vst.msk [vmem:[%s1180_s11 + $0x68] sm:$0xff] %vm759_vm2, %v748_v20 }
 0x2c2 PF: > { %s17_s24 = sadd.s32 1, %s990_s24  }
 0x2c3   : > { %p14_p4 = scmp.ge.s32.totalorder %s17_s24, 4  }
 0x2c5   :  { %16 = sbr.rel (!%p14_p4) target bundleno = 1 (0x1), region = 78 }

</bundles_post_ra>
